<compile_context>
chip_gen: v5e
topology: v5e:2x2
jax: 0.10.0
libtpu: 0.0.40
codegen_flags: <defaults>
</compile_context>

<pallas_src>
import functools

import numpy as np
import jax
import jax.numpy as jnp
from jax import lax
from jax.experimental import pallas as pl
from jax.experimental.pallas import tpu as pltpu

LANE = 128
TD_MAX = 32 * 1024            # max lane-tile width (f32) per grid step


def _round_up(x, m):
    return ((x + m - 1) // m) * m


def _vmem_budget_bytes():
    """Per-chip VMEM budget (v7x has only 64 MiB physical -> cap resident tiles)."""
    cap = 64 * 1024 * 1024
    try:
        info = pltpu.get_tpu_info()
        cap = int(getattr(info, "vmem_capacity_bytes", cap)) or cap
    except Exception:
        pass
    return int(min(cap, 128 * 1024 * 1024) * 0.75)


def _tile_plan(D, td_max=TD_MAX):
    """Return (Dp, td, n_tiles): padded width, lane-tile width, #tiles for D elems."""
    Dp0 = _round_up(max(int(D), 1), LANE)
    if Dp0 <= td_max:
        return Dp0, Dp0, 1
    n_tiles = -(-Dp0 // td_max)
    td = _round_up(-(-Dp0 // n_tiles), LANE)
    return td * n_tiles, td, n_tiles


# ----------------------------- Pallas kernels -----------------------------

def _fused_batched_kernel(scale_ref, beta_ref, delta_ref, last_ref, out_ref):
    """bg keys per grid step; each key fits one lane tile (Dp <= td_max).

    delta/last/out blocks: (bg, K, Dp); scale/beta: (bg, K, 1).
    """
    d = delta_ref[...]                                            # (bg, K, Dp) f32
    gram = jnp.einsum('gkd,gjd->gkj', d, d,
                      preferred_element_type=jnp.float32)         # (bg, K, K)
    logits = gram * scale_ref[...]                                # broadcast (bg,K,1)
    m = jnp.max(logits, axis=-1, keepdims=True)
    e = jnp.exp(logits - m)
    attn = e / jnp.sum(e, axis=-1, keepdims=True)
    cross = jnp.einsum('gkj,gjd->gkd', attn, d,
                       preferred_element_type=jnp.float32)        # (bg, K, Dp)
    out_ref[...] = last_ref[...] + d + beta_ref[...] * cross


def _fused_resident_kernel(scale_ref, beta_ref, delta_ref, last_ref, out_ref,
                           attn_ref, *, td):
    """Whole (K, Dp) delta resident in VMEM; grid = (keys, D-tiles).

    t == 0 : gram = delta @ delta^T (lane contraction, no transpose), softmax -> scratch
    every t: out tile = last + delta_tile + beta * (attn @ delta_tile)
    """
    t = pl.program_id(1)

    @pl.when(t == 0)
    def _():
        d = delta_ref[...]                                        # (K, Dp) f32
        gram = lax.dot_general(d, d,
                               dimension_numbers=(((1,), (1,)), ((), ())),
                               preferred_element_type=jnp.float32)
        logits = gram * scale_ref[...]                            # (K,K) * (K,1)
        m = jnp.max(logits, axis=-1, keepdims=True)
        e = jnp.exp(logits - m)
        attn_ref[...] = e / jnp.sum(e, axis=-1, keepdims=True)

    off = pl.multiple_of(t * td, LANE)
    d_tile = delta_ref[:, pl.ds(off, td)]                         # (K, td)
    cross = jnp.dot(attn_ref[...], d_tile, preferred_element_type=jnp.float32)
    out_ref[...] = last_ref[...] + d_tile + beta_ref[...] * cross


def _fused_stream_kernel(scale_ref, beta_ref, delta_ref, last_ref, out_ref,
                         gram_ref, attn_ref):
    """Streaming variant for keys too large to keep resident; grid = (keys, phase, tiles).

    phase 0: accumulate gram over D tiles; softmax into attn scratch on the last tile.
    phase 1: stream delta/last again and write output tiles. attn never touches HBM.
    """
    p = pl.program_id(1)
    t = pl.program_id(2)
    nt = pl.num_programs(2)

    @pl.when(jnp.logical_and(p == 0, t == 0))
    def _():
        gram_ref[...] = jnp.zeros_like(gram_ref)

    @pl.when(p == 0)
    def _():
        d = delta_ref[...]                                        # (K, td)
        gram_ref[...] += lax.dot_general(
            d, d, dimension_numbers=(((1,), (1,)), ((), ())),
            preferred_element_type=jnp.float32)

    @pl.when(jnp.logical_and(p == 0, t == nt - 1))
    def _():
        logits = gram_ref[...] * scale_ref[...]
        m = jnp.max(logits, axis=-1, keepdims=True)
        e = jnp.exp(logits - m)
        attn_ref[...] = e / jnp.sum(e, axis=-1, keepdims=True)

    @pl.when(p == 1)
    def _():
        d = delta_ref[...]
        cross = jnp.dot(attn_ref[...], d, preferred_element_type=jnp.float32)
        out_ref[...] = last_ref[...] + d + beta_ref[...] * cross


# ----------------------------- pallas_call builders -----------------------------

def _pick_bg(G, K, Dp, vmem_budget):
    """Keys per grid step for the batched kernel (bounded VMEM + small MXU batch)."""
    key_bytes = max(K * Dp * 4, 1)
    bg = max(1, min(G, (1 << 20) // key_bytes))          # target ~1 MiB operand tiles
    bg = min(bg, 8)                                      # bounded batched-matmul size
    bg = min(bg, max(1, int(0.5 * vmem_budget) // (6 * key_bytes)))
    return max(1, int(bg))


def _batched_call(scale_slab, beta_slab, delta_slab, last_slab, *, vmem_budget):
    G, K, Dp = delta_slab.shape
    bg = _pick_bg(G, K, Dp, vmem_budget)
    Gp = _round_up(G, bg)
    if Gp != G:
        pad = Gp - G
        delta_slab = jnp.pad(delta_slab, ((0, pad), (0, 0), (0, 0)))
        last_slab = jnp.pad(last_slab, ((0, pad), (0, 0), (0, 0)))
        beta_slab = jnp.pad(beta_slab, ((0, pad), (0, 0), (0, 0)))
        scale_slab = jnp.pad(scale_slab, ((0, pad), (0, 0), (0, 0)),
                             constant_values=1.0)

    out = pl.pallas_call(
        _fused_batched_kernel,
        out_shape=jax.ShapeDtypeStruct((Gp, K, Dp), jnp.float32),
        grid_spec=pltpu.PrefetchScalarGridSpec(
            num_scalar_prefetch=0,
            grid=(Gp // bg,),
            in_specs=[
                pl.BlockSpec((bg, K, 1), lambda g: (g, 0, 0)),     # scale
                pl.BlockSpec((bg, K, 1), lambda g: (g, 0, 0)),     # beta (clamped)
                pl.BlockSpec((bg, K, Dp), lambda g: (g, 0, 0)),    # delta
                pl.BlockSpec((bg, K, Dp), lambda g: (g, 0, 0)),    # last (aliased)
            ],
            out_specs=pl.BlockSpec((bg, K, Dp), lambda g: (g, 0, 0)),
        ),
        input_output_aliases={3: 0},
        compiler_params=pltpu.CompilerParams(
            dimension_semantics=("parallel",),
            vmem_limit_bytes=int(vmem_budget)),
        cost_estimate=pl.CostEstimate(
            flops=4 * Gp * K * K * Dp,
            transcendentals=Gp * K * K,
            bytes_accessed=3 * Gp * K * Dp * 4),
    )(scale_slab, beta_slab, delta_slab, last_slab)
    return out[:G] if Gp != G else out


def _resident_call(scale_slab, beta_slab, delta_slab, last_slab, *, td, n_tiles,
                   vmem_budget):
    G, K, Dp = delta_slab.shape
    return pl.pallas_call(
        functools.partial(_fused_resident_kernel, td=td),
        out_shape=jax.ShapeDtypeStruct((G, K, Dp), jnp.float32),
        grid_spec=pltpu.PrefetchScalarGridSpec(
            num_scalar_prefetch=0,
            grid=(G, n_tiles),
            in_specs=[
                pl.BlockSpec((None, K, 1), lambda g, t: (g, 0, 0)),    # scale
                pl.BlockSpec((None, K, 1), lambda g, t: (g, 0, 0)),    # beta
                pl.BlockSpec((None, K, Dp), lambda g, t: (g, 0, 0)),   # delta, resident
                pl.BlockSpec((None, K, td), lambda g, t: (g, 0, t)),   # last, tiled
            ],
            out_specs=pl.BlockSpec((None, K, td), lambda g, t: (g, 0, t)),
            scratch_shapes=[pltpu.VMEM((K, K), jnp.float32)],          # attn
        ),
        input_output_aliases={3: 0},
        compiler_params=pltpu.CompilerParams(
            dimension_semantics=("parallel", "arbitrary"),
            vmem_limit_bytes=int(vmem_budget)),
        cost_estimate=pl.CostEstimate(
            flops=4 * G * K * K * Dp,
            transcendentals=G * K * K,
            bytes_accessed=3 * G * K * Dp * 4),
    )(scale_slab, beta_slab, delta_slab, last_slab)


def _stream_call(scale_slab, beta_slab, delta_slab, last_slab, *, td, n_tiles,
                 vmem_budget):
    G, K, Dp = delta_slab.shape
    return pl.pallas_call(
        _fused_stream_kernel,
        out_shape=jax.ShapeDtypeStruct((G, K, Dp), jnp.float32),
        grid_spec=pltpu.PrefetchScalarGridSpec(
            num_scalar_prefetch=0,
            grid=(G, 2, n_tiles),
            in_specs=[
                pl.BlockSpec((None, K, 1), lambda g, p, t: (g, 0, 0)),       # scale
                pl.BlockSpec((None, K, 1), lambda g, p, t: (g, 0, 0)),       # beta
                pl.BlockSpec((None, K, td), lambda g, p, t: (g, 0, t)),      # delta
                pl.BlockSpec((None, K, td), lambda g, p, t: (g, 0, t * p)),  # last
            ],
            out_specs=pl.BlockSpec((None, K, td), lambda g, p, t: (g, 0, t * p)),
            scratch_shapes=[pltpu.VMEM((K, K), jnp.float32),                 # gram acc
                            pltpu.VMEM((K, K), jnp.float32)],                # attn
        ),
        input_output_aliases={3: 0},
        compiler_params=pltpu.CompilerParams(
            dimension_semantics=("parallel", "arbitrary", "arbitrary"),
            vmem_limit_bytes=int(vmem_budget)),
        cost_estimate=pl.CostEstimate(
            flops=4 * G * K * K * Dp,
            transcendentals=G * K * K,
            bytes_accessed=4 * G * K * Dp * 4),
    )(scale_slab, beta_slab, delta_slab, last_slab)


# ----------------------------- Fused per-group forward (jitted) -----------------------------

def _pad_flat(x, Dp):
    v = jnp.ravel(x).astype(jnp.float32)
    return v if v.size == Dp else jnp.pad(v, (0, Dp - v.size))


@functools.partial(
    jax.jit,
    static_argnames=("Dp", "td", "n_tiles", "vmem_budget", "force_streaming"))
def _group_forward(beta, deltas, lasts, *, Dp, td, n_tiles, vmem_budget,
                   force_streaming):
    """Pack -> fused Pallas update -> unpack, all inside one compiled program.

    deltas / lasts : tuple over keys of tuple over K models of original-shape arrays.
    beta           : (G, K) unclamped per-key betas.
    """
    G = len(deltas)
    K = len(deltas[0])

    delta_slab = jnp.stack([jnp.stack([_pad_flat(deltas[g][j], Dp)
                                       for j in range(K)]) for g in range(G)])
    last_slab = jnp.stack([jnp.stack([_pad_flat(lasts[g][j], Dp)
                                      for j in range(K)]) for g in range(G)])
    beta_slab = jnp.clip(beta.astype(jnp.float32), 0.0, 1.0).reshape(G, K, 1)
    scale_np = np.asarray([float(max(int(deltas[g][0].size), 1)) ** -0.5
                           for g in range(G)], np.float32).reshape(G, 1, 1)
    scale_slab = jnp.tile(jnp.asarray(scale_np), (1, K, 1))           # (G, K, 1)

    rows = _round_up(K, 8)
    resident_bytes = 2 * rows * Dp * 4 + 4 * rows * td * 4 + (1 << 16)

    if force_streaming:
        new_slab = _stream_call(scale_slab, beta_slab, delta_slab, last_slab,
                                td=td, n_tiles=n_tiles, vmem_budget=vmem_budget)
    elif n_tiles == 1:
        new_slab = _batched_call(scale_slab, beta_slab, delta_slab, last_slab,
                                 vmem_budget=vmem_budget)
    elif resident_bytes <= int(0.8 * vmem_budget):
        new_slab = _resident_call(scale_slab, beta_slab, delta_slab, last_slab,
                                  td=td, n_tiles=n_tiles, vmem_budget=vmem_budget)
    else:
        new_slab = _stream_call(scale_slab, beta_slab, delta_slab, last_slab,
                                td=td, n_tiles=n_tiles, vmem_budget=vmem_budget)

    outs = []
    for g in range(G):
        row = []
        for j in range(K):
            ref = lasts[g][j]
            row.append(new_slab[g, j, :ref.size].reshape(ref.shape).astype(ref.dtype))
        outs.append(tuple(row))
    return tuple(outs)


# ----------------------------- Module wrapper -----------------------------

class HyperCrossAttentionPallas:
    """JAX/Pallas port of HyperCrossAttention.

    `param_names` plays the role of model.named_parameters() name strings.
    """

    def __init__(self, param_names, K, init_beta=1.0, force_streaming=False,
                 vmem_budget_bytes=None, td_max=TD_MAX):
        self.K = K
        self.layer_names = sorted({'.'.join(n.split('.')[1:-1]) for n in param_names})
        self.beta_names = [n.replace('.', '_') for n in self.layer_names]
        self.beta = {bn: jnp.ones((K,), jnp.float32) * init_beta for bn in self.beta_names}
        self._force_streaming = bool(force_streaming)
        self._vmem_budget = (int(vmem_budget_bytes) if vmem_budget_bytes is not None
                             else _vmem_budget_bytes())
        self.td_max = max(LANE, int(td_max))

    def __call__(self, last_param_dict_list, delta_dict_list):
        assert self.K == len(last_param_dict_list)
        new = [dict(d) for d in last_param_dict_list]          # arrays are immutable

        # Reproduce the PyTorch (layer name, key) visiting order.  A key matched by
        # several layer names gets one additive update per match; repeated matches of
        # the same key go to later "rounds" so each round batches only unique keys.
        delta_keys = list(delta_dict_list[0].keys())
        tasks = [(lname, k) for lname in self.layer_names
                 for k in delta_keys if lname in k]
        rounds, seen = [], {}
        for lname, k in tasks:
            r = seen.get(k, 0)
            seen[k] = r + 1
            if len(rounds) <= r:
                rounds.append({})
            shape = tuple(delta_dict_list[0][k].shape)
            D = max(1, int(np.prod(shape, dtype=np.int64)))
            geom = _tile_plan(D, self.td_max)                  # (Dp, td, n_tiles)
            rounds[r].setdefault(geom, []).append((lname, k, D, shape))

        for rnd in rounds:
            for (Dp, td, n_tiles), group in rnd.items():
                self._run_group(new, delta_dict_list, group, Dp, td, n_tiles)
        return new

    def _run_group(self, new, delta_dict_list, group, Dp, td, n_tiles):
        if not group:
            return
        K = self.K
        deltas = tuple(tuple(delta_dict_list[j][k] for j in range(K))
                       for (_, k, _, _) in group)
        lasts = tuple(tuple(new[j][k] for j in range(K))
                      for (_, k, _, _) in group)
        beta = jnp.stack([self.beta[lname.replace('.', '_')]
                          for (lname, _, _, _) in group])      # (G, K), unclamped

        outs = _group_forward(beta, deltas, lasts,
                              Dp=Dp, td=td, n_tiles=n_tiles,
                              vmem_budget=self._vmem_budget,
                              force_streaming=self._force_streaming)

        for g, (_, k, _, _) in enumerate(group):
            for j in range(K):
                new[j][k] = outs[g][j]


# ----------------------------- Pure-NumPy reference -----------------------------

def _ref_forward(module, last_list, delta_list):
    new = [{k: np.asarray(v, np.float64) for k, v in d.items()} for d in last_list]
    for name in module.layer_names:
        layer_beta = np.clip(np.asarray(module.beta[name.replace('.', '_')]), 0.0, 1.0)
        keys = [k for k in delta_list[0] if name in k]
        for key in keys:
            cross = np.stack([np.asarray(delta_list[j][key]).reshape(-1)
                              for j in range(module.K)]).astype(np.float64)
            D = cross.shape[-1]
            logits = (cross @ cross.T) * (D ** -0.5)
            logits -= logits.max(-1, keepdims=True)
            attn = np.exp(logits)
            attn /= attn.sum(-1, keepdims=True)
            out = attn @ cross
            for i in range(module.K):
                shp = np.asarray(delta_list[i][key]).shape
                new_delta = np.asarray(delta_list[i][key], np.float64) + \
                    layer_beta[i] * out[i].reshape(shp)
                new[i][key] = new[i][key] + new_delta
    return new


# ----------------------------- Main -----------------------------

if __name__ == "__main__":
    K = 3
    # Synthetic "decoder" parameter set (names mimic model.named_parameters()).
    param_shapes = {
        "decoder.block1.conv.weight": (4, 4, 3, 3),
        "decoder.block1.conv.bias":   (4,),
        "decoder.block2.fc.weight":   (8, 32),
        "decoder.block2.fc.bias":     (8,),
    }

    key = jax.random.PRNGKey(0)
    last_param_dict_list, delta_dict_list = [], []
    for j in range(K):
        last_d, delta_d = {}, {}
        for name, shp in param_shapes.items():
            key, k1, k2 = jax.random.split(key, 3)
            last_d[name] = jax.random.normal(k1, shp, dtype=jnp.float32)
            delta_d[name] = 0.1 * jax.random.normal(k2, shp, dtype=jnp.float32)
        last_param_dict_list.append(last_d)
        delta_dict_list.append(delta_d)

    def _check(result, ref):
        for i in range(K):
            for name in param_shapes:
                np.testing.assert_allclose(np.asarray(result[i][name]),
                                           ref[i][name], rtol=2e-4, atol=2e-4)

    # Default path: key-batched fused kernel (all keys fit a single lane tile).
    module = HyperCrossAttentionPallas(list(param_shapes.keys()), K, init_beta=0.7)
    new_params = module(last_param_dict_list, delta_dict_list)
    jax.block_until_ready(new_params)
    ref = _ref_forward(module, last_param_dict_list, delta_dict_list)
    _check(new_params, ref)

    # Resident-tiled path: force tiny lane tiles so weights take the tiled kernel.
    module_t = HyperCrossAttentionPallas(list(param_shapes.keys()), K, init_beta=0.7,
                                         td_max=128)
    new_params_t = module_t(last_param_dict_list, delta_dict_list)
    jax.block_until_ready(new_params_t)
    _check(new_params_t, ref)

    # Two-phase streaming path (used for keys too large to keep resident in VMEM).
    module_s = HyperCrossAttentionPallas(list(param_shapes.keys()), K, init_beta=0.7,
                                         force_streaming=True)
    new_params_s = module_s(last_param_dict_list, delta_dict_list)
    jax.block_until_ready(new_params_s)
    _check(new_params_s, ref)

    print("KERNEL_OK")
</pallas_src>

<mosaic_0001>
module attributes {stable_mosaic.version = 11 : i64} {
  func.func @_fused_batched_kernel(%arg0: i32, %arg1: memref<2x3x1xf32, #tpu.memory_space<vmem>>, %arg2: memref<2x3x1xf32, #tpu.memory_space<vmem>>, %arg3: memref<2x3x256xf32, #tpu.memory_space<vmem>>, %arg4: memref<2x3x256xf32, #tpu.memory_space<vmem>>, %arg5: memref<2x3x256xf32, #tpu.memory_space<vmem>>) attributes {dimension_semantics = [#tpu.dimension_semantics<parallel>], iteration_bounds = array<i64: 1>, scalar_prefetch = 0 : i64, scratch_operands = 0 : i64, tpu.core_type = #tpu.core_type<tc>, window_params = [{transform_indices = @transform_0, window_bounds = array<i64: 2, 3, 1>}, {transform_indices = @transform_1, window_bounds = array<i64: 2, 3, 1>}, {transform_indices = @transform_2, window_bounds = array<i64: 2, 3, 256>}, {transform_indices = @transform_3, window_bounds = array<i64: 2, 3, 256>}, {transform_indices = @transform_4, window_bounds = array<i64: 2, 3, 256>}]} {
    %c0 = arith.constant 0 : index
    %c0_0 = arith.constant 0 : index
    %c0_1 = arith.constant 0 : index
    %0 = vector.load %arg3[%c0, %c0_0, %c0_1] : memref<2x3x256xf32, #tpu.memory_space<vmem>>, vector<2x3x256xf32>
    "tpu.trace_start"() <{level = 10 : i32, message = "gkd,gjd->gkj"}> : () -> ()
    %cst = arith.constant dense<0.000000e+00> : vector<2x3x3xf32>
    %1 = tpu.matmul %0, %0, %cst {dimension_numbers = #tpu.dot_dimension_numbers<[2], [2], [1], [1], [0, 0, 0, 1, 1, 1], [0], [0]>} : vector<2x3x256xf32>, vector<2x3x256xf32>, vector<2x3x3xf32> -> vector<2x3x3xf32>
    "tpu.trace_stop"() : () -> ()
    %c0_2 = arith.constant 0 : index
    %c0_3 = arith.constant 0 : index
    %c0_4 = arith.constant 0 : index
    %2 = vector.load %arg1[%c0_2, %c0_3, %c0_4] : memref<2x3x1xf32, #tpu.memory_space<vmem>>, vector<2x3x1xf32>
    %3 = vector.broadcast %2 : vector<2x3x1xf32> to vector<2x3x3xf32>
    %4 = arith.mulf %1, %3 : vector<2x3x3xf32>
    %cst_5 = arith.constant dense<0xFF800000> : vector<2x3xf32>
    %5 = vector.multi_reduction <maximumf>, %4, %cst_5 [2] : vector<2x3x3xf32> to vector<2x3xf32>
    %6 = vector.shape_cast %5 : vector<2x3xf32> to vector<2x3x1xf32>
    %7 = vector.broadcast %6 : vector<2x3x1xf32> to vector<2x3x3xf32>
    %8 = arith.subf %4, %7 : vector<2x3x3xf32>
    %9 = math.exp %8 : vector<2x3x3xf32>
    %cst_6 = arith.constant dense<0.000000e+00> : vector<2x3xf32>
    %10 = vector.multi_reduction <add>, %9, %cst_6 [2] : vector<2x3x3xf32> to vector<2x3xf32>
    %11 = vector.shape_cast %10 : vector<2x3xf32> to vector<2x3x1xf32>
    %12 = vector.broadcast %11 : vector<2x3x1xf32> to vector<2x3x3xf32>
    %13 = arith.divf %9, %12 : vector<2x3x3xf32>
    "tpu.trace_start"() <{level = 10 : i32, message = "gkj,gjd->gkd"}> : () -> ()
    %cst_7 = arith.constant dense<0.000000e+00> : vector<2x3x256xf32>
    %14 = tpu.matmul %13, %0, %cst_7 {dimension_numbers = #tpu.dot_dimension_numbers<[2], [1], [1], [2], [0, 0, 0, 1, 1, 2], [0], [0]>} : vector<2x3x3xf32>, vector<2x3x256xf32>, vector<2x3x256xf32> -> vector<2x3x256xf32>
    "tpu.trace_stop"() : () -> ()
    %c0_8 = arith.constant 0 : index
    %c0_9 = arith.constant 0 : index
    %c0_10 = arith.constant 0 : index
    %15 = vector.load %arg4[%c0_8, %c0_9, %c0_10] : memref<2x3x256xf32, #tpu.memory_space<vmem>>, vector<2x3x256xf32>
    %16 = arith.addf %15, %0 : vector<2x3x256xf32>
    %c0_11 = arith.constant 0 : index
    %c0_12 = arith.constant 0 : index
    %c0_13 = arith.constant 0 : index
    %17 = vector.load %arg2[%c0_11, %c0_12, %c0_13] : memref<2x3x1xf32, #tpu.memory_space<vmem>>, vector<2x3x1xf32>
    %18 = vector.broadcast %17 : vector<2x3x1xf32> to vector<2x3x256xf32>
    %19 = arith.mulf %18, %14 : vector<2x3x256xf32>
    %20 = arith.addf %16, %19 : vector<2x3x256xf32>
    %c0_14 = arith.constant 0 : index
    %c0_15 = arith.constant 0 : index
    %c0_16 = arith.constant 0 : index
    %21 = vector.load %arg5[%c0_14, %c0_15, %c0_16] : memref<2x3x256xf32, #tpu.memory_space<vmem>>, vector<2x3x256xf32>
    tpu.vector_store %arg5[%c0_14, %c0_15, %c0_16], %20 {strides = array<i32>} : memref<2x3x256xf32, #tpu.memory_space<vmem>>, vector<2x3x256xf32>,
    return
  }
  func.func @transform_0(%arg0: i32) -> (i32, i32, i32) {
    %c0_i32 = arith.constant 0 : i32
    %c0_i32_0 = arith.constant 0 : i32
    %c0_i32_1 = arith.constant 0 : i32
    return %arg0, %c0_i32, %c0_i32_0 : i32, i32, i32
  }
  func.func @transform_1(%arg0: i32) -> (i32, i32, i32) {
    %c0_i32 = arith.constant 0 : i32
    %c0_i32_0 = arith.constant 0 : i32
    %c0_i32_1 = arith.constant 0 : i32
    return %arg0, %c0_i32, %c0_i32_0 : i32, i32, i32
  }
  func.func @transform_2(%arg0: i32) -> (i32, i32, i32) {
    %c0_i32 = arith.constant 0 : i32
    %c0_i32_0 = arith.constant 0 : i32
    %c0_i32_1 = arith.constant 0 : i32
    return %arg0, %c0_i32, %c0_i32_0 : i32, i32, i32
  }
  func.func @transform_3(%arg0: i32) -> (i32, i32, i32) {
    %c0_i32 = arith.constant 0 : i32
    %c0_i32_0 = arith.constant 0 : i32
    %c0_i32_1 = arith.constant 0 : i32
    return %arg0, %c0_i32, %c0_i32_0 : i32, i32, i32
  }
  func.func @transform_4(%arg0: i32) -> (i32, i32, i32) {
    %c0_i32 = arith.constant 0 : i32
    %c0_i32_0 = arith.constant 0 : i32
    %c0_i32_1 = arith.constant 0 : i32
    return %arg0, %c0_i32, %c0_i32_0 : i32, i32, i32
  }
}

</mosaic_0001>

<bundles_post_ra>
// kernel: squeeze.6
= control target key start
LH: loop header
LB: loop body
LE: loop exit
PB: predicated region body
PF: predicated region fallthrough
CT: control target
= control target key end

     0   :  { %s462_s8 = smov 127   ;;  %s463_s9 = smov 121   ;;  %vm293_vm0 = vcmask 1031168   ;;  %vm7_vm1 = vcmask 23552   ;;  %vm297_vm2 = vcmask 15360   ;;  %vm300_vm3 = vcmask 23568   ;;  %s616_s0 = inlined_call_operand.vmem [shape: f32[144], index: 0, kind: input, shape index: {}]   ;;  %s617_s1 = inlined_call_operand.vmem [shape: f32[4,4,3,3], index: 1, kind: output, shape index: {}]  }
   0x1   :  { %v4_v0 = vld [vmem:[%s616_s0] sm:$0x3]  ;;  %s461_s0 = smov 124   ;;  %s464_s10 = smov 122  }
   0x2   :  { %5 = vst [vmem:[#allocation1] sm:$0x3] %v4_v0  ;;  %s465_s11 = smov 125   ;;  %s466_s12 = smov 119  }
   0x3   :  { %s467_s13 = smov 116   ;;  %s468_s14 = smov 118  }
   0x4   :  { %s469_s15 = smov 115   ;;  %s470_s16 = smov 110  }
   0x5   :  { %s471_s17 = smov 113   ;;  %s472_s18 = smov 107  }
   0x6   :  { %s473_s19 = smov 101   ;;  %s474_s20 = smov 104  }
   0x7   :  { %s475_s21 = smov 98   ;;  %s476_s22 = smov 92  }
   0x8   :  { %s477_s23 = smov 95   ;;  %s478_s24 = smov 89  }
   0x9   :  { %v23_v1 = vld [vmem:[#allocation1 + $0x1] sm:$0x1]   ;;  %v29_v4 = vld [vmem:[#allocation1] sm:$0x1]   ;;  %s479_s25 = smov 83   ;;  %s480_s26 = smov 86  }
   0xa   :  { %v10_v2 = vld [vmem:[#allocation1 + $0x1] sm:$0x1]   ;;  %24 = vrot.lane.b32.xlu1 %v23_v1, %s461_s0  ;;  %v16_v5 = vld [vmem:[#allocation1] sm:$0x1]   ;;  %s481_s27 = smov 80   ;;  %s482_s28 = smov 74  }
   0xb   :  { %11 = vrot.lane.b32.xlu0 %v10_v2, %s462_s8  ;;  %v36_v3 = vld [vmem:[#allocation1 + $0x1] sm:$0x1]   ;;  %v42_v6 = vld [vmem:[#allocation1] sm:$0x1]   ;;  %s483_s29 = smov 77   ;;  %s484_s30 = smov 71  }
   0xc   :  { %37 = vrot.lane.b32.xlu2 %v36_v3, %s463_s9  ;;  %v55_v7 = vld [vmem:[#allocation1] sm:$0x1]   ;;  %v49_v8 = vld [vmem:[#allocation1 + $0x1] sm:$0x1]   ;;  %s485_s2 = smov 65   ;;  %s486_s3 = smov 68  }
   0xd   :  { %v62_v9 = vld [vmem:[#allocation1 + $0x1] sm:$0x1]   ;;  %v74_v10 = vld [vmem:[#allocation1] sm:$0x1]   ;;  %s487_s4 = smov 62   ;;  %s488_s5 = smov 56  }
   0xe   :  { %v68_v11 = vld [vmem:[#allocation1] sm:$0x1]   ;;  %s489_s6 = smov 59   ;;  %v292_v32 = vld [vmem:[#allocation1 + $0x1] sm:$0x1]   ;;  %s490_s7 = smov 53  }
   0xf   :  { %v80_v12 = vld [vmem:[#allocation1] sm:$0x1]   ;;  %s491_s0 = smov 2   ;;  %s492_s8 = smov 50  }
  0x10   :  { %v92_v13 = vld [vmem:[#allocation1] sm:$0x1]   ;;  %s493_s9 = smov 47  }
  0x11   :  { %v86_v14 = vld [vmem:[#allocation1] sm:$0x1]  }
  0x12   :  { %30 = vrot.lane.b32.xlu1 %v29_v4, %s464_s10  ;;  %v98_v15 = vld [vmem:[#allocation1] sm:$0x1]   ;;  %s494_s10 = smov 41  }
  0x13   :  { %17 = vrot.lane.b32.xlu0 %v16_v5, %s465_s11  ;;  %v110_v16 = vld [vmem:[#allocation1] sm:$0x1]   ;;  %s495_s11 = smov 44  }
  0x14   :  { %43 = vrot.lane.b32.xlu2 %v42_v6, %s466_s12  ;;  %v104_v17 = vld [vmem:[#allocation1] sm:$0x1]   ;;  %s496_s12 = smov 38  }
  0x15   :  { %v116_v18 = vld [vmem:[#allocation1] sm:$0x1]  }
  0x16   :  { %v128_v19 = vld [vmem:[#allocation1] sm:$0x1]  }
  0x17   :  { %v122_v20 = vld [vmem:[#allocation1] sm:$0x1]  }
  0x18   :  { %v134_v21 = vld [vmem:[#allocation1] sm:$0x1]  }
  0x19   :  { %v146_v22 = vld [vmem:[#allocation1] sm:$0x1]  }
  0x1a   :  { %56 = vrot.lane.b32.xlu1 %v55_v7, %s467_s13  ;;  %v140_v23 = vld [vmem:[#allocation1] sm:$0x1]   ;;  %s497_s13 = smov 32  }
  0x1b   :  { %50 = vrot.lane.b32.xlu0 %v49_v8, %s468_s14  ;;  %v152_v24 = vld [vmem:[#allocation1] sm:$0x1]   ;;  %s498_s14 = smov 35  }
  0x1c   :  { %63 = vrot.lane.b32.xlu2 %v62_v9, %s469_s15  ;;  %v164_v25 = vld [vmem:[#allocation1] sm:$0x1]   ;;  %s499_s15 = smov 29  }
  0x1d   :  { %v158_v26 = vld [vmem:[#allocation1] sm:$0x1]  }
  0x1e   :  { %v170_v27 = vld [vmem:[#allocation1] sm:$0x1]  }
  0x1f   :  { %v182_v28 = vld [vmem:[#allocation1] sm:$0x1]  }
  0x20   :  { %v176_v29 = vld [vmem:[#allocation1] sm:$0x1]  }
  0x21   :  { %v188_v30 = vld [vmem:[#allocation1] sm:$0x1]  }
  0x22   :  { %75 = vrot.lane.b32.xlu1 %v74_v10, %s470_s16  ;;  %v290_v31 = vld [vmem:[#allocation1] sm:$0x1]   ;;  %s500_s16 = smov 23  }
  0x23   :  { %69 = vrot.lane.b32.xlu0 %v68_v11, %s471_s17  ;;  %v294_v33 = vsel %vm293_vm0, %v292_v32, %v290_v31  ;;  %v194_v34 = vld [vmem:[#allocation1] sm:$0x1]   ;;  %s501_s17 = smov 26  }
  0x24   :  { %81 = vrot.lane.b32.xlu2 %v80_v12, %s472_s18  ;;  %v200_v35 = vld [vmem:[#allocation1] sm:$0x1]   ;;  %s502_s18 = smov 20  }
  0x25   :  { %v212_v36 = vld [vmem:[#allocation1] sm:$0x1]  }
  0x26   :  { %v206_v37 = vld [vmem:[#allocation1] sm:$0x1]  }
  0x27   :  { %v218_v38 = vld [vmem:[#allocation1] sm:$0x1]  }
  0x28   :  { %v6_v39 = vld [vmem:[#allocation1] sm:$0x1]  }
  0x29   :  { %8 = vst.msk [vmem:[#allocation0] sm:$0x1] %vm7_vm1, %v6_v39   ;;  %v230_v41 = vld [vmem:[#allocation1] sm:$0x1]  }
  0x2a   :  { %93 = vrot.lane.b32.xlu1 %v92_v13, %s473_s19  ;;  %v224_v42 = vld [vmem:[#allocation1] sm:$0x1]   ;;  %s503_s19 = smov 14  }
  0x2b   :  { %87 = vrot.lane.b32.xlu0 %v86_v14, %s474_s20  ;;  %v236_v43 = vld [vmem:[#allocation1] sm:$0x1]   ;;  %s504_s20 = smov 17  }
  0x2c   :  { %99 = vrot.lane.b32.xlu2 %v98_v15, %s475_s21  ;;  %v248_v45 = vld [vmem:[#allocation1] sm:$0x1]   ;;  %s505_s21 = smov 11  }
  0x2d   :  { %v242_v46 = vld [vmem:[#allocation1] sm:$0x1]  }
  0x2e   :  { %v254_v47 = vld [vmem:[#allocation1] sm:$0x1]  }
  0x2f   :  { %v266_v49 = vld [vmem:[#allocation1] sm:$0x1]  }
  0x30   :  { %v260_v50 = vld [vmem:[#allocation1] sm:$0x1]  }
  0x31   :  { %v272_v51 = vld [vmem:[#allocation1] sm:$0x1]  }
  0x32   :  { %111 = vrot.lane.b32.xlu1 %v110_v16, %s476_s22  ;;  %v284_v55 = vld [vmem:[#allocation1] sm:$0x1]   ;;  %s506_s22 = smov 5  }
  0x33   :  { %105 = vrot.lane.b32.xlu0 %v104_v17, %s477_s23  ;;  %v278_v56 = vld [vmem:[#allocation1] sm:$0x1]   ;;  %s507_s23 = smov 8  }
  0x34   :  { %117 = vrot.lane.b32.xlu2 %v116_v18, %s478_s24 }
  0x3a   :  { %129 = vrot.lane.b32.xlu1 %v128_v19, %s479_s25 }
  0x3b   :  { %123 = vrot.lane.b32.xlu0 %v122_v20, %s480_s26 }
  0x3c   :  { %135 = vrot.lane.b32.xlu2 %v134_v21, %s481_s27 }
  0x42   :  { %147 = vrot.lane.b32.xlu1 %v146_v22, %s482_s28 }
  0x43   :  { %141 = vrot.lane.b32.xlu0 %v140_v23, %s483_s29 }
  0x44   :  { %153 = vrot.lane.b32.xlu2 %v152_v24, %s484_s30 }
  0x4a   :  { %165 = vrot.lane.b32.xlu1 %v164_v25, %s485_s2 }
  0x4b   :  { %159 = vrot.lane.b32.xlu0 %v158_v26, %s486_s3 }
  0x4c   :  { %171 = vrot.lane.b32.xlu2 %v170_v27, %s487_s4 }
  0x52   :  { %183 = vrot.lane.b32.xlu1 %v182_v28, %s488_s5 }
  0x53   :  { %177 = vrot.lane.b32.xlu0 %v176_v29, %s489_s6 }
  0x54   :  { %189 = vrot.lane.b32.xlu2 %v188_v30, %s490_s7 }
  0x5a   :  { %295 = vrot.lane.b32.xlu1 %v294_v33, %s491_s0 }
  0x5b   :  { %195 = vrot.lane.b32.xlu0 %v194_v34, %s492_s8 }
  0x5c   :  { %201 = vrot.lane.b32.xlu2 %v200_v35, %s493_s9 }
  0x62   :  { %213 = vrot.lane.b32.xlu1 %v212_v36, %s494_s10 }
  0x63   :  { %207 = vrot.lane.b32.xlu0 %v206_v37, %s495_s11 }
  0x64   :  { %219 = vrot.lane.b32.xlu2 %v218_v38, %s496_s12 }
  0x66   :  { %v38_v40 = vpop.permute.xlu2 %37  }
  0x67   :  { %41 = vst.msk [vmem:[#allocation0 + $0x78] sm:$0x1] %vm7_vm1, %v38_v40  }
  0x6a   :  { %231 = vrot.lane.b32.xlu1 %v230_v41, %s497_s13 }
  0x6b   :  { %225 = vrot.lane.b32.xlu0 %v224_v42, %s498_s14 }
  0x6c   :  { %237 = vrot.lane.b32.xlu2 %v236_v43, %s499_s15 }
  0x6e   :  { %v44_v44 = vpop.permute.xlu2 %43  }
  0x6f   :  { %47 = vst.msk [vmem:[#allocation0 + $0x8] sm:$0x1] %vm7_vm1, %v44_v44  }
  0x72   :  { %249 = vrot.lane.b32.xlu1 %v248_v45, %s500_s16 }
  0x73   :  { %243 = vrot.lane.b32.xlu0 %v242_v46, %s501_s17 }
  0x74   :  { %255 = vrot.lane.b32.xlu2 %v254_v47, %s502_s18 }
  0x76   :  { %v64_v48 = vpop.permute.xlu2 %63  }
  0x77   :  { %67 = vst.msk [vmem:[#allocation0 + $0x7a] sm:$0x1] %vm7_vm1, %v64_v48  }
  0x7a   :  { %267 = vrot.lane.b32.xlu1 %v266_v49, %s503_s19 }
  0x7b   :  { %261 = vrot.lane.b32.xlu0 %v260_v50, %s504_s20 }
  0x7c   :  { %v25_v52 = vpop.permute.xlu1 %24   ;;  %273 = vrot.lane.b32.xlu2 %v272_v51, %s505_s21 }
  0x7d   :  { %v12_v53 = vpop.permute.xlu0 %11   ;;  %28 = vst.msk [vmem:[#allocation0 + $0x72] sm:$0x1] %vm7_vm1, %v25_v52  }
  0x7e   :  { %15 = vst.msk [vmem:[#allocation0 + $0x71] sm:$0x1] %vm7_vm1, %v12_v53   ;;  %v82_v54 = vpop.permute.xlu2 %81  }
  0x7f   :  { %85 = vst.msk [vmem:[#allocation0 + $0x11] sm:$0x1] %vm7_vm1, %v82_v54  }
  0x82   :  { %285 = vrot.lane.b32.xlu1 %v284_v55, %s506_s22 }
  0x83   :  { %279 = vrot.lane.b32.xlu0 %v278_v56, %s507_s23 }
  0x84   :  { %v31_v57 = vpop.permute.xlu1 %30  }
  0x85   :  { %v18_v58 = vpop.permute.xlu0 %17   ;;  %34 = vst.msk [vmem:[#allocation0 + $0x2] sm:$0x1] %vm7_vm1, %v31_v57  }
  0x86   :  { %21 = vst.msk [vmem:[#allocation0 + $0x1] sm:$0x1] %vm7_vm1, %v18_v58   ;;  %v100_v59 = vpop.permute.xlu2 %99  }
  0x87   :  { %103 = vst.msk [vmem:[#allocation0 + $0x19] sm:$0x1] %vm7_vm1, %v100_v59  }
  0x8c   :  { %v57_v60 = vpop.permute.xlu1 %56  }
  0x8d   :  { %v51_v61 = vpop.permute.xlu0 %50   ;;  %v305_v62 = vld [vmem:[#allocation0] sm:$0xf]  ;;  %60 = vst.msk [vmem:[#allocation0 + $0x9] sm:$0x1] %vm7_vm1, %v57_v60  }
  0x8e   :  { %308 = vst [vmem:[%s617_s1] sm:$0xf] %v305_v62  ;;  %v118_v63 = vpop.permute.xlu2 %117  }
  0x8f   :  { %54 = vst.msk [vmem:[#allocation0 + $0x79] sm:$0x1] %vm7_vm1, %v51_v61  }
  0x90   :  { %121 = vst.msk [vmem:[#allocation0 + $0x21] sm:$0x1] %vm7_vm1, %v118_v63  }
  0x94   :  { %v76_v0 = vpop.permute.xlu1 %75  }
  0x95   :  { %v70_v1 = vpop.permute.xlu0 %69   ;;  %79 = vst.msk [vmem:[#allocation0 + $0x10] sm:$0x1] %vm7_vm1, %v76_v0  }
  0x96   :  { %v394_v2 = vld [vmem:[#allocation0 + $0x78] sm:$0xf]  ;;  %73 = vst.msk [vmem:[#allocation0 + $0xa] sm:$0x1] %vm7_vm1, %v70_v1   ;;  %v136_v3 = vpop.permute.xlu2 %135  }
  0x97   :  { %413 = vst [vmem:[%s617_s1 + $0x3c] sm:$0xf] %v394_v2 }
  0x98   :  { %139 = vst.msk [vmem:[#allocation0 + $0x29] sm:$0x1] %vm7_vm1, %v136_v3  }
  0x9c   :  { %v94_v4 = vpop.permute.xlu1 %93  }
  0x9d   :  { %v88_v5 = vpop.permute.xlu0 %87   ;;  %v310_v6 = vld [vmem:[#allocation0 + $0x8] sm:$0xf]  ;;  %97 = vst.msk [vmem:[#allocation0 + $0x18] sm:$0x1] %vm7_vm1, %v94_v4  }
  0x9e   :  { %399 = vst [vmem:[%s617_s1 + $0x4] sm:$0xf] %v310_v6  ;;  %v154_v7 = vpop.permute.xlu2 %153  }
  0x9f   :  { %91 = vst.msk [vmem:[#allocation0 + $0x12] sm:$0x1] %vm7_vm1, %v88_v5  }
  0xa0   :  { %157 = vst.msk [vmem:[#allocation0 + $0x31] sm:$0x1] %vm7_vm1, %v154_v7  }
  0xa4   :  { %v112_v8 = vpop.permute.xlu1 %111  }
  0xa5   :  { %v106_v9 = vpop.permute.xlu0 %105   ;;  %115 = vst.msk [vmem:[#allocation0 + $0x20] sm:$0x1] %vm7_vm1, %v112_v8  }
  0xa6   :  { %v316_v10 = vld [vmem:[#allocation0 + $0x10] sm:$0xf]  ;;  %109 = vst.msk [vmem:[#allocation0 + $0x1a] sm:$0x1] %vm7_vm1, %v106_v9   ;;  %v172_v11 = vpop.permute.xlu2 %171  }
  0xa7   :  { %400 = vst [vmem:[%s617_s1 + $0x8] sm:$0xf] %v316_v10 }
  0xa8   :  { %175 = vst.msk [vmem:[#allocation0 + $0x39] sm:$0x1] %vm7_vm1, %v172_v11  }
  0xac   :  { %v130_v12 = vpop.permute.xlu1 %129  }
  0xad   :  { %v124_v13 = vpop.permute.xlu0 %123   ;;  %v322_v14 = vld [vmem:[#allocation0 + $0x18] sm:$0xf]  ;;  %133 = vst.msk [vmem:[#allocation0 + $0x28] sm:$0x1] %vm7_vm1, %v130_v12  }
  0xae   :  { %401 = vst [vmem:[%s617_s1 + $0xc] sm:$0xf] %v322_v14  ;;  %v190_v15 = vpop.permute.xlu2 %189  }
  0xaf   :  { %127 = vst.msk [vmem:[#allocation0 + $0x22] sm:$0x1] %vm7_vm1, %v124_v13  }
  0xb0   :  { %193 = vst.msk [vmem:[#allocation0 + $0x41] sm:$0x1] %vm7_vm1, %v190_v15  }
  0xb4   :  { %v148_v16 = vpop.permute.xlu1 %147  }
  0xb5   :  { %v142_v17 = vpop.permute.xlu0 %141   ;;  %151 = vst.msk [vmem:[#allocation0 + $0x30] sm:$0x1] %vm7_vm1, %v148_v16  }
  0xb6   :  { %v328_v18 = vld [vmem:[#allocation0 + $0x20] sm:$0xf]  ;;  %145 = vst.msk [vmem:[#allocation0 + $0x2a] sm:$0x1] %vm7_vm1, %v142_v17   ;;  %v202_v19 = vpop.permute.xlu2 %201  }
  0xb7   :  { %402 = vst [vmem:[%s617_s1 + $0x10] sm:$0xf] %v328_v18 }
  0xb8   :  { %205 = vst.msk [vmem:[#allocation0 + $0x48] sm:$0x1] %vm7_vm1, %v202_v19  }
  0xbc   :  { %v166_v20 = vpop.permute.xlu1 %165  }
  0xbd   :  { %v160_v21 = vpop.permute.xlu0 %159   ;;  %v334_v22 = vld [vmem:[#allocation0 + $0x28] sm:$0xf]  ;;  %169 = vst.msk [vmem:[#allocation0 + $0x38] sm:$0x1] %vm7_vm1, %v166_v20  }
  0xbe   :  { %403 = vst [vmem:[%s617_s1 + $0x14] sm:$0xf] %v334_v22  ;;  %v220_v23 = vpop.permute.xlu2 %219  }
  0xbf   :  { %163 = vst.msk [vmem:[#allocation0 + $0x32] sm:$0x1] %vm7_vm1, %v160_v21  }
  0xc0   :  { %223 = vst.msk [vmem:[#allocation0 + $0x50] sm:$0x1] %vm7_vm1, %v220_v23  }
  0xc4   :  { %v184_v24 = vpop.permute.xlu1 %183  }
  0xc5   :  { %v178_v25 = vpop.permute.xlu0 %177   ;;  %187 = vst.msk [vmem:[#allocation0 + $0x40] sm:$0x1] %vm7_vm1, %v184_v24  }
  0xc6   :  { %v340_v26 = vld [vmem:[#allocation0 + $0x30] sm:$0xf]  ;;  %181 = vst.msk [vmem:[#allocation0 + $0x3a] sm:$0x1] %vm7_vm1, %v178_v25   ;;  %v238_v27 = vpop.permute.xlu2 %237  }
  0xc7   :  { %404 = vst [vmem:[%s617_s1 + $0x18] sm:$0xf] %v340_v26 }
  0xc8   :  { %241 = vst.msk [vmem:[#allocation0 + $0x58] sm:$0x1] %vm7_vm1, %v238_v27  }
  0xcc   :  { %v296_v28 = vpop.permute.xlu1 %295  }
  0xcd   :  { %v196_v29 = vpop.permute.xlu0 %195   ;;  %v346_v30 = vld [vmem:[#allocation0 + $0x38] sm:$0xf]  ;;  %299 = vst.msk [vmem:[#allocation0 + $0x70] sm:$0x1] %vm297_vm2, %v296_v28  }
  0xce   :  { %405 = vst [vmem:[%s617_s1 + $0x1c] sm:$0xf] %v346_v30  ;;  %v256_v31 = vpop.permute.xlu2 %255  }
  0xcf   :  { %302 = vst.msk [vmem:[#allocation0 + $0x70] sm:$0x1] %vm300_vm3, %v296_v28  }
  0xd0   :  { %199 = vst.msk [vmem:[#allocation0 + $0x42] sm:$0x1] %vm7_vm1, %v196_v29  }
  0xd1   :  { %259 = vst.msk [vmem:[#allocation0 + $0x60] sm:$0x1] %vm7_vm1, %v256_v31  }
  0xd4   :  { %v214_v32 = vpop.permute.xlu1 %213  }
  0xd5   :  { %v208_v33 = vpop.permute.xlu0 %207   ;;  %217 = vst.msk [vmem:[#allocation0 + $0x4a] sm:$0x1] %vm7_vm1, %v214_v32  }
  0xd6   :  { %v388_v34 = vld [vmem:[#allocation0 + $0x70] sm:$0xf]  ;;  %211 = vst.msk [vmem:[#allocation0 + $0x49] sm:$0x1] %vm7_vm1, %v208_v33   ;;  %v274_v36 = vpop.permute.xlu2 %273  }
  0xd7   :  { %v352_v35 = vld [vmem:[#allocation0 + $0x40] sm:$0xf]  ;;  %412 = vst [vmem:[%s617_s1 + $0x38] sm:$0xf] %v388_v34 }
  0xd8   :  { %406 = vst [vmem:[%s617_s1 + $0x20] sm:$0xf] %v352_v35 }
  0xd9   :  { %277 = vst.msk [vmem:[#allocation0 + $0x68] sm:$0x1] %vm7_vm1, %v274_v36  }
  0xdc   :  { %v232_v37 = vpop.permute.xlu1 %231  }
  0xdd   :  { %v226_v38 = vpop.permute.xlu0 %225   ;;  %v358_v39 = vld [vmem:[#allocation0 + $0x48] sm:$0xf]  ;;  %235 = vst.msk [vmem:[#allocation0 + $0x52] sm:$0x1] %vm7_vm1, %v232_v37  }
  0xde   :  { %407 = vst [vmem:[%s617_s1 + $0x24] sm:$0xf] %v358_v39 }
  0xdf   :  { %229 = vst.msk [vmem:[#allocation0 + $0x51] sm:$0x1] %vm7_vm1, %v226_v38  }
  0xe4   :  { %v250_v40 = vpop.permute.xlu1 %249  }
  0xe5   :  { %v244_v41 = vpop.permute.xlu0 %243   ;;  %253 = vst.msk [vmem:[#allocation0 + $0x5a] sm:$0x1] %vm7_vm1, %v250_v40  }
  0xe6   :  { %v364_v42 = vld [vmem:[#allocation0 + $0x50] sm:$0xf]  ;;  %247 = vst.msk [vmem:[#allocation0 + $0x59] sm:$0x1] %vm7_vm1, %v244_v41  }
  0xe7   :  { %408 = vst [vmem:[%s617_s1 + $0x28] sm:$0xf] %v364_v42 }
  0xec   :  { %v268_v43 = vpop.permute.xlu1 %267  }
  0xed   :  { %v262_v44 = vpop.permute.xlu0 %261   ;;  %v370_v45 = vld [vmem:[#allocation0 + $0x58] sm:$0xf]  ;;  %271 = vst.msk [vmem:[#allocation0 + $0x62] sm:$0x1] %vm7_vm1, %v268_v43  }
  0xee   :  { %409 = vst [vmem:[%s617_s1 + $0x2c] sm:$0xf] %v370_v45 }
  0xef   :  { %265 = vst.msk [vmem:[#allocation0 + $0x61] sm:$0x1] %vm7_vm1, %v262_v44  }
  0xf4   :  { %v286_v46 = vpop.permute.xlu1 %285  }
  0xf5   :  { %v280_v47 = vpop.permute.xlu0 %279   ;;  %289 = vst.msk [vmem:[#allocation0 + $0x6a] sm:$0x1] %vm7_vm1, %v286_v46  }
  0xf6   :  { %v376_v48 = vld [vmem:[#allocation0 + $0x60] sm:$0xf]  ;;  %283 = vst.msk [vmem:[#allocation0 + $0x69] sm:$0x1] %vm7_vm1, %v280_v47  }
  0xf7   :  { %410 = vst [vmem:[%s617_s1 + $0x30] sm:$0xf] %v376_v48 }
  0xfd   :  { %v382_v49 = vld [vmem:[#allocation0 + $0x68] sm:$0xf] }
  0xfe   :  { %411 = vst [vmem:[%s617_s1 + $0x34] sm:$0xf] %v382_v49 }

// kernel: squeeze.10
= control target key start
LH: loop header
LB: loop body
LE: loop exit
PB: predicated region body
PF: predicated region fallthrough
CT: control target
= control target key end

     0   :  { %s90_s0 = inlined_call_operand.vmem [shape: f32[256], index: 0, kind: input, shape index: {}]   ;;  %s91_s1 = inlined_call_operand.hbm [shape: f32[8,32], index: 1, kind: output, shape index: {}]  }
   0x1   :  { %v5_v0 = vld [vmem:[%s90_s0] sm:$0x3] }
   0x2   :  { %6 = vst [vmem:[#allocation2] sm:$0x3] %v5_v0 }
   0x3   :  { %2 = vsyncpa [#allocation1], 0  ;;  %s70_s0 = smov 96   ;;  %s71_s8 = smov 32   ;;  %vm8_vm0 = vcmask 261120  }
   0x4   :  { %s72_s9 = smov 64   ;;  %s73_s10 = smov [#allocation0]  }
   0x5   :  { %s31_s11 = sshll.u32 %s73_s10, 4  ;;  %s33_s1 = sshll.u32 %s91_s1, 4  ;;  %s32_s11 = int_to_ptr.vmem [resolvable:$true] %s31_s11  ;;  %s34_s1 = int_to_ptr.hbm [resolvable:$true] %s33_s1 }
   0x9   :  { %v10_v1 = vld [vmem:[#allocation2] sm:$0x3]  }
   0xa   :  { %v22_v2 = vld [vmem:[#allocation2] sm:$0x3]   ;;  %11 = vrot.lane.b32.xlu0 %v10_v1, %s70_s0 }
   0xb   :  { %23 = vrot.lane.b32.xlu1 %v22_v2, %s71_s8  ;;  %v16_v3 = vld [vmem:[#allocation2] sm:$0x3]  }
   0xc   :  { %v7_v4 = vld [vmem:[#allocation2] sm:$0x3]  }
   0xd   :  { %9 = vst.msk [vmem:[#allocation0] ss:$4 sm:$0x3] %vm8_vm0, %v7_v4  }
  0x12   :  { %17 = vrot.lane.b32.xlu0 %v16_v3, %s72_s9 }
  0x7c   :  { %v12_v5 = vpop.permute.xlu0 %11  }
  0x7d   :  { %v24_v6 = vpop.permute.xlu1 %23   ;;  %15 = vst.msk [vmem:[#allocation0 + $0x1] ss:$4 sm:$0x3] %vm8_vm0, %v12_v5  }
  0x7e   :  { %27 = vst.msk [vmem:[#allocation0 + $0x3] ss:$4 sm:$0x3] %vm8_vm0, %v24_v6  }
  0x84   :  { %v18_v7 = vpop.permute.xlu0 %17  }
  0x85   :  { %21 = vst.msk [vmem:[#allocation0 + $0x2] ss:$4 sm:$0x3] %vm8_vm0, %v18_v7  }
  0x86   :  { %36 = dma.vmem_to_hbm [thread:$0]  %s32_s11, 128, %s34_s1, [#allocation1]  }
  0x87   :  { %68 = dma.done.wait [#allocation1], 128  }
  0x88   :  { %69 = vsyncadd [#allocation1], 4294967168 }
  0x89   :  { %39 = vsyncpa [#allocation1], 1 }

// kernel: _group_forward.1
= control target key start
LH: loop header
LB: loop body
LE: loop exit
PB: predicated region body
PF: predicated region fallthrough
CT: control target
= control target key end

     0   :  { %v344_v1 = vmov 0   ;;  %vm135_vm0 = vcmask 18432   ;;  %vm191_vm1 = vcmask 1042432   ;;  %vm187_vm6 = vcmask 23552   ;;  %s420_s2 = inlined_call_operand.vmem [shape: f32[2,3,256], index: 2, kind: input, shape index: {}]   ;;  %s421_s0 = inlined_call_operand.vmem [shape: f32[2,3,1], index: 0, kind: input, shape index: {}]   ;;  %s422_s1 = inlined_call_operand.vmem [shape: f32[2,3,1], index: 1, kind: input, shape index: {}]   ;;  %s423_s3 = inlined_call_operand.vmem [shape: f32[2,3,256], index: 3, kind: input, shape index: {}, may-alias: {3,4}]   ;;  %s424_s4 = inlined_call_operand.vmem [shape: f32[2,3,256], index: 4, kind: output, shape index: {}, may-alias: {3,4}]  }
   0x1   :  { %v373_v0 = vld [vmem:[%s420_s2] sm:$0x77]  ;;  %334 = vset.pattern.permute.xlu0 %v344_v1  ;;  %335 = vset.pattern.permute.xlu1 %v344_v1  ;;  %v386_v6 = vld [vmem:[%s420_s2 + $0x8] sm:$0x77]  ;;  %vm312_vm11 = vcmask 1043456  }
   0x2   :  { %20 = vst [vmem:[#allocation1] ss:$2 sm:$0xff] %v373_v0  ;;  %v122_v2 = vld [vmem:[%s421_s0 + $0x4] sm:$0x7]  ;;  %v121_v5 = vld [vmem:[%s421_s0] sm:$0x7] }
   0x3   :  { %130 = vperm.xlu0 %334, %v122_v2   ;;  %v290_v9 = vld [vmem:[%s422_s1] sm:$0x7]  ;;  %v291_v40 = vld [vmem:[%s422_s1 + $0x4] sm:$0x7] }
   0x9   :  { %v21_v3 = vld.sshfl [vmem:[#allocation1] sm:$0xff pattern:$0x75316420]  ;;  %v22_v4 = vld.sshfl [vmem:[#allocation1 + $0x8] sm:$0xff pattern:$0x75316420] }
   0xa   :  { %25 = vst [vmem:[#allocation1] ss:$2 sm:$0xff] %v373_v0 }
   0xb   :  { %125 = vperm.xlu0 %334, %v121_v5  }
  0x11   :  { %v26_v7 = vld.sshfl [vmem:[#allocation1] sm:$0xff pattern:$0x75316420]  ;;  %v27_v8 = vld.sshfl [vmem:[#allocation1 + $0x8] sm:$0xff pattern:$0x75316420] }
  0x12   :  { %71 = vst [vmem:[#allocation1] ss:$2 sm:$0xff] %v386_v6  ;;  %45 = vmatpush.xpose.msra.mxu0 %v26_v7  ;;  %65 = vmatpush.xpose.msra.mxu1 %v27_v8 }
  0x13   :  { %294 = vperm.xlu0 %334, %v290_v9   ;;  %v286_v9 = vld [vmem:[%s423_s3] sm:$0x77] }
  0x15   :  { %46 = vmatmul.f32.vlgmr.msra.gmra.mxu0 %v21_v3  ;;  %66 = vmatmul.f32.vlgmr.msra.gmra.mxu1 %v22_v4  ;;  %v287_v3 = vld [vmem:[%s423_s3 + $0x8] sm:$0x77] }
  0x19   :  { %v72_v10 = vld.sshfl [vmem:[#allocation1] sm:$0xff pattern:$0x75316420]  ;;  %v73_v11 = vld.sshfl [vmem:[#allocation1 + $0x8] sm:$0xff pattern:$0x75316420] }
  0x1a   :  { %76 = vst [vmem:[#allocation1] ss:$2 sm:$0xff] %v386_v6 }
  0x21   :  { %v77_v12 = vld.sshfl [vmem:[#allocation1] sm:$0xff pattern:$0x75316420]  ;;  %v78_v13 = vld.sshfl [vmem:[#allocation1 + $0x8] sm:$0xff pattern:$0x75316420] }
  0x22   :  { %96 = vmatpush.xpose.msra.mxu2 %v77_v12  ;;  %116 = vmatpush.xpose.msra.mxu3 %v78_v13  ;;  %184 = vst [vmem:[#allocation1] ss:$2 sm:$0xff] %v373_v0 }
  0x25   :  { %97 = vmatmul.f32.vlgmr.msra.gmra.mxu2 %v72_v10  ;;  %117 = vmatmul.f32.vlgmr.msra.gmra.mxu3 %v73_v11  ;;  %v289_v10 = vadd.f32 %v287_v3, %v386_v6 }
  0x29   :  { %v185_v14 = vld.sshfl [vmem:[#allocation1] sm:$0xff pattern:$0x75316420]  ;;  %v186_v15 = vld.sshfl [vmem:[#allocation1 + $0x8] sm:$0xff pattern:$0x75316420] }
  0x2a   :  { %236 = vst [vmem:[#allocation1] ss:$2 sm:$0xff] %v386_v6  ;;  %327 = vmatpush.msk.msrb.mxu1 %vm191_vm1, %v186_v15  ;;  %325 = vmatpush.msk.msrb.mxu0 %vm191_vm1, %v185_v14 }
  0x31   :  { %v238_v38 = vld.sshfl [vmem:[#allocation1 + $0x8] sm:$0xff pattern:$0x75316420]  ;;  %v237_v39 = vld.sshfl [vmem:[#allocation1] sm:$0xff pattern:$0x75316420] }
  0x32   :  { %331 = vmatpush.msk.msrb.mxu3 %vm191_vm1, %v238_v38  ;;  %329 = vmatpush.msk.msrb.mxu2 %vm191_vm1, %v237_v39 }
  0x75   :  { %v131_v16 = vpop.permute.xlu0 %130 }
  0x7d   :  { %v126_v25 = vpop.permute.xlu0 %125 }
  0x85   :  { %v295_v7 = vpop.permute.xlu0 %294 }
  0x92   :  { %v47_v20 = vpop.f32.mrf.mxu0  ;;  %v67_v21 = vpop.f32.mrf.mxu1 }
  0x93   :  { %v68_v23 = vadd.f32 %v67_v21, %v47_v20 }
  0x95   :  { %v133_v26 = vmul.f32 %v126_v25, %v68_v23 }
  0x97   :  { %v136_v27 = vsel %vm135_vm0, %v133_v26, -inf }
  0xa8   :  { %v98_v17 = vpop.f32.mrf.mxu2  ;;  %v118_v18 = vpop.f32.mrf.mxu3 }
  0xa9   :  { %v119_v19 = vadd.f32 %v118_v18, %v98_v17 }
  0xab   :  { %v134_v22 = vmul.f32 %v131_v16, %v119_v19  ;;  %v288_v16 = vadd.f32 %v286_v9, %v373_v0 }
  0xad   :  { %v139_v24 = vsel %vm135_vm0, %v134_v22, -inf }
  0xae   :  { %140 = vmax.xlane.f32.xlu1 %v139_v24 }
  0xb6   :  { %137 = vmax.xlane.f32.xlu1 %v136_v27 }
  0xcf   :  { %299 = vperm.xlu1 %335, %v291_v40  }
 0x121   :  { %v141_v28 = vpop.xlane.xlu1 %140 }
 0x122   :  { %v143_v29 = vsub.f32 %v134_v22, %v141_v28 }
 0x124   :  { %v146_v30 = vmul.f32 1.442695, %v143_v29 }
 0x126   :  { %336 = vpow2.f32 %v146_v30 }
 0x129   :  { %v138_v31 = vpop.xlane.xlu1 %137 }
 0x12a   :  { %v142_v32 = vsub.f32 %v133_v26, %v138_v31 }
 0x12c   :  { %v337_v33 = vpop.eup %336  ;;  %v144_v34 = vmul.f32 1.442695, %v142_v32 }
 0x12d   :  { %v151_v35 = vsel %vm135_vm0, %v337_v33, 0.0 }
 0x12e   :  { %338 = vpow2.f32 %v144_v34  ;;  %152 = vadd.xlane.f32.xlu2 %v151_v35 }
 0x134   :  { %v339_v36 = vpop.eup %338 }
 0x135   :  { %v148_v37 = vsel %vm135_vm0, %v339_v36, 0.0 }
 0x136   :  { %149 = vadd.xlane.f32.xlu2 %v148_v37 }
 0x141   :  { %v300_v2 = vpop.permute.xlu1 %299 }
 0x1a1   :  { %v153_v41 = vpop.xlane.xlu2 %152 }
 0x1a2   :  { %340 = vrcp.f32 %v153_v41  ;;  %v180_v46 = vand.u32 2147483648, %v153_v41  ;;  %v178_v48 = vand.u32 2147483647, %v153_v41  ;;  %vm174_vm3 = vweird.f32 %v153_v41 }
 0x1a4   :  { %v181_v51 = vor.u32 1.1754944e-38, %v180_v46  ;;  %vm179_vm5 = vcmp.eq.f32.partialorder %v178_v48, 8.507059e+37 }
 0x1a8   :  { %v341_v42 = vpop.eup %340 }
 0x1a9   :  { %v170_v43 = vmul.f32 %v341_v42, %v153_v41  ;;  %v150_v44 = vpop.xlane.xlu2 %149  ;;  %vm175_vm2 = vweird.f32 %v341_v42 }
 0x1aa   :  { %342 = vrcp.f32 %v150_v44  ;;  %vm176_vm4 = vmor %vm174_vm3, %vm175_vm2  ;;  %v165_v57 = vand.u32 2147483648, %v150_v44  ;;  %v163_v59 = vand.u32 2147483647, %v150_v44  ;;  %vm159_vm8 = vweird.f32 %v150_v44 }
 0x1ab   :  { %v171_v45 = vsub.f32 1.0, %v170_v43 }
 0x1ac   :  { %v166_v61 = vor.u32 1.1754944e-38, %v165_v57  ;;  %vm164_vm10 = vcmp.eq.f32.partialorder %v163_v59, 8.507059e+37 }
 0x1ad   :  { %v172_v47 = vmul.f32 %v341_v42, %v171_v45 }
 0x1af   :  { %v173_v49 = vadd.f32 %v341_v42, %v172_v47 }
 0x1b0   :  { %v343_v50 = vpop.eup %342 }
 0x1b1   :  { %v155_v52 = vmul.f32 %v343_v50, %v150_v44  ;;  %v177_v53 = vsel %vm176_vm4, %v341_v42, %v173_v49  ;;  %vm160_vm7 = vweird.f32 %v343_v50 }
 0x1b2   :  { %v182_v54 = vsel %vm179_vm5, %v181_v51, %v177_v53  ;;  %vm161_vm9 = vmor %vm159_vm8, %vm160_vm7 }
 0x1b3   :  { %v156_v55 = vsub.f32 1.0, %v155_v52  ;;  %v183_v56 = vmul.f32 %v337_v33, %v182_v54 }
 0x1b5   :  { %v157_v58 = vmul.f32 %v343_v50, %v156_v55  ;;  %330 = vmatmul.msk.f32.vlgmr.msrb.gmra.mxu2 %vm187_vm6, %v183_v56  ;;  %332 = vmatmul.msk.f32.vlgmr.msrb.gmra.mxu3 %vm187_vm6, %v183_v56 }
 0x1b7   :  { %v158_v60 = vadd.f32 %v343_v50, %v157_v58 }
 0x1b9   :  { %v162_v62 = vsel %vm161_vm9, %v343_v50, %v158_v60 }
 0x1ba   :  { %v167_v63 = vsel %vm164_vm10, %v166_v61, %v162_v62 }
 0x1bb   :  { %v168_v1 = vmul.f32 %v339_v36, %v167_v63 }
 0x1bd   :  { %326 = vmatmul.msk.f32.vlgmr.msrb.gmra.mxu0 %vm187_vm6, %v168_v1  ;;  %328 = vmatmul.msk.f32.vlgmr.msrb.gmra.mxu1 %vm187_vm6, %v168_v1 }
 0x238   :  { %v263_v4 = vpop.f32.mrf.mxu2  ;;  %v283_v5 = vpop.f32.mrf.mxu3 }
 0x239   :  { %v305_v8 = vmul.f32 %v300_v2, %v283_v5  ;;  %v304_v13 = vmul.f32 %v300_v2, %v263_v4 }
 0x23a   :  { %v213_v11 = vpop.f32.mrf.mxu0  ;;  %v233_v12 = vpop.f32.mrf.mxu1 }
 0x23b   :  { %v311_v14 = vrot.slane %v305_v8, 4  ;;  %v303_v15 = vmul.f32 %v295_v7, %v233_v12  ;;  %v302_v18 = vmul.f32 %v295_v7, %v213_v11 }
 0x23d   :  { %v314_v17 = vsel %vm312_vm11, %v304_v13, %v311_v14  ;;  %v310_v19 = vrot.slane %v303_v15, 4 }
 0x23e   :  { %v318_v20 = vadd.f32 %v314_v17, %v289_v10 }
 0x23f   :  { %v313_v21 = vsel %vm312_vm11, %v302_v18, %v310_v19 }
 0x240   :  { %320 = vst [vmem:[%s424_s4 + $0x8] sm:$0x77] %v318_v20  ;;  %v317_v22 = vadd.f32 %v313_v21, %v288_v16 }
 0x242   :  { %319 = vst [vmem:[%s424_s4] sm:$0x77] %v317_v22 }

</bundles_post_ra>
